<compile_context>
chip_gen: v6e
topology: v6e:2x2x1
jax: 0.10.0
libtpu: 0.0.40
codegen_flags: <defaults>
</compile_context>

<pallas_src>
import jax
import jax.numpy as jnp
from jax.experimental import pallas as pl
from jax.experimental.pallas import tpu as pltpu


def linear_sub_relu_kernel(x_ref, w_ref, c_ref, o_ref):
    # x_ref: (tm, IN)  activations (f32 or bf16)
    # w_ref: (IN, tn)  pre-transposed weight (f32 or bf16)
    # c_ref: (1,  tn)  f32 constant = bias - other (pre-folded in the wrapper)
    # o_ref: (tm, tn)  f32 output
    y = jnp.dot(x_ref[...], w_ref[...], preferred_element_type=jnp.float32)
    o_ref[...] = jnp.maximum(y + c_ref[...], 0.0).astype(o_ref.dtype)


def _round_up(x, m):
    return ((x + m - 1) // m) * m


def linear_sub_relu(x, w_t, bias, other, *, force_tiled=False):
    """y = relu(x @ w_t + bias - other); x:(N, IN), w_t:(IN, OUT)."""
    N, IN = x.shape
    OUT = w_t.shape[1]

    # Fold bias - other into one (1, OUT) f32 constant, once, in the wrapper.
    c = (bias.reshape(1, OUT).astype(jnp.float32)
         - other.reshape(1, OUT).astype(jnp.float32))

    # ------------------------------------------------------------------ #
    # Path 1: whole problem fits comfortably in VMEM as one block.
    # No padding, no output slicing, no extra HBM ops.  This is the path
    # the literal (1, 32) case takes.
    # ------------------------------------------------------------------ #
    total_bytes = 4 * (N * IN + IN * OUT + OUT + N * OUT)
    if total_bytes <= 4 * 1024 * 1024 and not force_tiled:
        x32 = x if x.dtype == jnp.float32 else x.astype(jnp.float32)
        w32 = w_t if w_t.dtype == jnp.float32 else w_t.astype(jnp.float32)
        return pl.pallas_call(
            linear_sub_relu_kernel,
            out_shape=jax.ShapeDtypeStruct((N, OUT), jnp.float32),
            in_specs=[
                pl.BlockSpec(memory_space=pltpu.MemorySpace.VMEM),
                pl.BlockSpec(memory_space=pltpu.MemorySpace.VMEM),
                pl.BlockSpec(memory_space=pltpu.MemorySpace.VMEM),
            ],
            out_specs=pl.BlockSpec(memory_space=pltpu.MemorySpace.VMEM),
        )(x32, w32, c)

    # ------------------------------------------------------------------ #
    # Path 2: tiled, pipelined path for real batch / feature sizes.
    # ------------------------------------------------------------------ #
    x_bf = x.astype(jnp.bfloat16)
    w_bf = w_t.astype(jnp.bfloat16)

    out_pad128 = _round_up(OUT, 128)
    weight_bytes = IN * out_pad128 * 2  # bf16
    if weight_bytes <= 4 * 1024 * 1024:
        tn = out_pad128                  # full weight stays VMEM-resident
    else:
        tn = 512 if out_pad128 >= 512 else out_pad128
    OUT_pad = _round_up(OUT, tn)

    # Row tile: large tiles amortize the ~0.35 us/step overhead; gate on IN so
    # the double-buffered (tm, IN) input tile stays modest on v5e's 16 MiB
    # scoped default and v7x's 64 MiB physical VMEM.
    if IN <= 512:
        tm = 512
    elif IN <= 2048:
        tm = 256
    else:
        tm = 128
    tm = min(tm, _round_up(max(N, 8), 8))
    N_pad = _round_up(N, tm)

    x_p = jnp.pad(x_bf, ((0, N_pad - N), (0, 0)))
    w_p = jnp.pad(w_bf, ((0, 0), (0, OUT_pad - OUT)))
    c_p = jnp.pad(c, ((0, 0), (0, OUT_pad - OUT)))

    # Explicit scoped-VMEM budget: double-buffered tiles + headroom, capped
    # below v7x's 64 MiB physical VMEM (and raising v5e's 16 MiB default).
    tile_bytes = 2 * (tm * IN * 2 + IN * tn * 2 + tn * 4 + tm * tn * 4)
    vmem_limit = int(min(max(2 * tile_bytes, 32 * 1024 * 1024),
                         48 * 1024 * 1024))

    # TODO(synk): add a K ("arbitrary") grid axis + f32 VMEM accumulator if
    # in_features ever grows beyond a single VMEM block (IN >~ 8K).

    if OUT_pad == tn:
        # Single grid axis over rows; weight + fused constant stay resident
        # (constant block index (0, 0)), only x / out are streamed.
        grid = (N_pad // tm,)
        in_specs = [
            pl.BlockSpec((tm, IN), lambda i: (i, 0)),
            pl.BlockSpec((IN, tn), lambda i: (0, 0)),
            pl.BlockSpec((1, tn), lambda i: (0, 0)),
        ]
        out_specs = pl.BlockSpec((tm, tn), lambda i: (i, 0))
        dim_sem = ("parallel",)
    else:
        # Output-column axis OUTER, row axis INNER: the weight tile's block
        # index is unchanged across the inner loop -> no per-row weight re-DMA.
        grid = (OUT_pad // tn, N_pad // tm)
        in_specs = [
            pl.BlockSpec((tm, IN), lambda j, i: (i, 0)),
            pl.BlockSpec((IN, tn), lambda j, i: (0, j)),
            pl.BlockSpec((1, tn), lambda j, i: (0, j)),
        ]
        out_specs = pl.BlockSpec((tm, tn), lambda j, i: (i, j))
        dim_sem = ("parallel", "parallel")

    out = pl.pallas_call(
        linear_sub_relu_kernel,
        out_shape=jax.ShapeDtypeStruct((N_pad, OUT_pad), jnp.float32),
        grid_spec=pltpu.PrefetchScalarGridSpec(
            num_scalar_prefetch=0,
            grid=grid,
            in_specs=in_specs,
            out_specs=out_specs,
        ),
        compiler_params=pltpu.CompilerParams(
            dimension_semantics=dim_sem,
            vmem_limit_bytes=vmem_limit),
    )(x_p, w_p, c_p)

    return out[:N, :OUT]


if __name__ == "__main__":
    IN_FEATURES = 32
    OUT_FEATURES = 32
    N = 1  # matches x1 = torch.randn(1, 32)

    key = jax.random.PRNGKey(0)
    kx, kw, kb, ko = jax.random.split(key, 4)

    # Deterministic parameter init (PyTorch Linear default: U(-1/sqrt(in), 1/sqrt(in)))
    bound = 1.0 / jnp.sqrt(jnp.float32(IN_FEATURES))
    weight = jax.random.uniform(kw, (OUT_FEATURES, IN_FEATURES),
                                jnp.float32, -bound, bound)  # PyTorch (out, in)
    bias = jax.random.uniform(kb, (OUT_FEATURES,), jnp.float32, -bound, bound)
    # `other` is an undefined free variable in the source; materialize it
    # deterministically with the shape of the linear output.
    other = jax.random.normal(ko, (1, OUT_FEATURES), jnp.float32)

    x1 = jax.random.normal(kx, (N, IN_FEATURES), jnp.float32)
    w_t = weight.T  # (IN, OUT) so the kernel computes x @ W directly

    # --- literal (1, 32) case: single-block f32 path, no padding/slicing ---
    out = jax.block_until_ready(linear_sub_relu(x1, w_t, bias, other))
    ref = jnp.maximum(x1 @ w_t + bias.reshape(1, -1) - other, 0.0)
    assert out.shape == (N, OUT_FEATURES)
    assert jnp.allclose(out, ref, atol=2e-2, rtol=2e-2)

    # --- sanity-check the tiled bf16 path on a modest batched shape ---
    N2, IN2, OUT2 = 300, 96, 176
    k2x, k2w, k2b, k2o = jax.random.split(jax.random.PRNGKey(1), 4)
    x2 = jax.random.normal(k2x, (N2, IN2), jnp.float32)
    w2 = jax.random.normal(k2w, (IN2, OUT2), jnp.float32) / jnp.sqrt(jnp.float32(IN2))
    b2 = jax.random.normal(k2b, (OUT2,), jnp.float32) * 0.1
    o2 = jax.random.normal(k2o, (1, OUT2), jnp.float32) * 0.1
    out2 = jax.block_until_ready(
        linear_sub_relu(x2, w2, b2, o2, force_tiled=True))
    ref2 = jnp.maximum(x2 @ w2 + b2.reshape(1, -1) - o2, 0.0)
    assert out2.shape == (N2, OUT2)
    # bf16-streamed operands -> loosened tolerance (f32 accumulation).
    assert jnp.allclose(out2, ref2, atol=5e-2, rtol=5e-2)

    print("KERNEL_OK")
</pallas_src>

<mosaic_0001>
module attributes {stable_mosaic.version = 11 : i64} {
  func.func @linear_sub_relu_kernel(%arg0: memref<1x32xf32, #tpu.memory_space<vmem>>, %arg1: memref<32x32xf32, #tpu.memory_space<vmem>>, %arg2: memref<1x32xf32, #tpu.memory_space<vmem>>, %arg3: memref<1x32xf32, #tpu.memory_space<vmem>>) attributes {dimension_semantics = [], scalar_prefetch = 0 : i64, scratch_operands = 0 : i64, tpu.core_type = #tpu.core_type<tc>} {
    %c0 = arith.constant 0 : index
    %c0_0 = arith.constant 0 : index
    %0 = vector.load %arg0[%c0, %c0_0] : memref<1x32xf32, #tpu.memory_space<vmem>>, vector<1x32xf32>
    %c0_1 = arith.constant 0 : index
    %c0_2 = arith.constant 0 : index
    %1 = vector.load %arg1[%c0_1, %c0_2] : memref<32x32xf32, #tpu.memory_space<vmem>>, vector<32x32xf32>
    %cst = arith.constant dense<0.000000e+00> : vector<1x32xf32>
    %2 = tpu.matmul %0, %1, %cst {dimension_numbers = #tpu.dot_dimension_numbers<[1], [0], [0], [1], [0, 0, 1, 1], [], []>} : vector<1x32xf32>, vector<32x32xf32>, vector<1x32xf32> -> vector<1x32xf32>
    %c0_3 = arith.constant 0 : index
    %c0_4 = arith.constant 0 : index
    %3 = vector.load %arg2[%c0_3, %c0_4] : memref<1x32xf32, #tpu.memory_space<vmem>>, vector<1x32xf32>
    %4 = arith.addf %2, %3 : vector<1x32xf32>
    %cst_5 = arith.constant 0.000000e+00 : f32
    %5 = vector.broadcast %cst_5 : f32 to vector<1x32xf32>
    %6 = arith.maximumf %4, %5 : vector<1x32xf32>
    %c0_6 = arith.constant 0 : index
    %c0_7 = arith.constant 0 : index
    %7 = vector.load %arg3[%c0_6, %c0_7] : memref<1x32xf32, #tpu.memory_space<vmem>>, vector<1x32xf32>
    tpu.vector_store %arg3[%c0_6, %c0_7], %6 {strides = array<i32>} : memref<1x32xf32, #tpu.memory_space<vmem>>, vector<1x32xf32>,
    return
  }
}

</mosaic_0001>

<bundles_post_ra>
// kernel: tpu_custom_call.1
= control target key start
LH: loop header
LB: loop body
LE: loop exit
PB: predicated region body
PF: predicated region fallthrough
CT: control target
= control target key end

     0   :  { %8 = vsyncpa [#allocation3], 0  ;;  %s269_s0 = inlined_call_operand.hbm [shape: f32[1,32], index: 0, kind: input, shape index: {}]   ;;  %s270_s1 = inlined_call_operand.hbm [shape: f32[32,32], index: 1, kind: input, shape index: {}]   ;;  %s271_s2 = inlined_call_operand.vmem [shape: f32[1,32], index: 2, kind: input, shape index: {}]   ;;  %s272_s3 = inlined_call_operand.hbm [shape: f32[1,32], index: 3, kind: output, shape index: {}]  }
   0x1   :  { %9 = vsyncpa [#allocation6], 0 }
   0x2   :  { %10 = vsyncpa [#allocation4], 0  ;;  %s230_s12 = smov [#allocation2]   ;;  %s231_s14 = smov [#allocation5]  }
   0x3   :  { %s17_s13 = sshll.u32 %s230_s12, 4  ;;  %s26_s15 = sshll.u32 %s231_s14, 4  ;;  %s18_s13 = int_to_ptr.vmem [resolvable:$true] %s17_s13  ;;  %s27_s15 = int_to_ptr.vmem [resolvable:$true] %s26_s15 }
   0x4   :  { %s172_s16 = scalar_lea.vmem %s18_s13, 16  ;;  %s176_s17 = scalar_lea.vmem %s18_s13, 32 }
   0x5   :  { %p173_p0 = scmp.ne.s32.totalorder %s18_s13, %s172_s16  ;;  %p177_p1 = scmp.lt.s32.totalorder %s18_s13, %s18_s13 }
   0x6   :  { %p178_p2 = scmp.lt.s32.totalorder %s176_s17, %s172_s16 }
   0x8   :  { %p179_p3 = por %p178_p2, %p177_p1 }
   0xa   :  { %p180_p4 = pnand %p179_p3, %p173_p0 }
   0xc   :  { %183 = shalt.err (!%p180_p4)
}
   0xd   :  { %20 = dma.hbm_to_vmem [thread:$0]  %s269_s0, 16, %s18_s13, [#allocation3]  }
   0xe   :  { %s192_s20 = scalar_lea.vmem %s27_s15, 512  ;;  %p197_p6 = scmp.lt.s32.totalorder %s27_s15, %s27_s15 }
   0xf   :  { %p193_p5 = scmp.ne.s32.totalorder %s27_s15, %s192_s20  ;;  %p198_p7 = scmp.lt.s32.totalorder %s192_s20, %s192_s20 }
  0x11   :  { %p199_p8 = por %p198_p7, %p197_p6 }
  0x13   :  { %p200_p9 = pnand %p199_p8, %p193_p5 }
  0x15   :  { %203 = shalt.err (!%p200_p9)
}
  0x16   :  { %s232_s21 = smov 128   ;;  %s233_s22 = smov 8  }
  0x17   :  { %32 = dma.hbm_to_vmem [thread:$0]  %s270_s1, 512, %s27_s15, [#allocation6], %s232_s21, %s232_s21, %s233_s22  }
  0x18   :  { %224 = dma.done.wait [#allocation3], 16  }
  0x19   :  { %225 = vsyncadd [#allocation3], 4294967280 }
  0x1a   :  { %226 = dma.done.wait [#allocation6], 512  }
  0x1b   :  { %227 = vsyncadd [#allocation6], 4294966784  ;;  %v234_v0 = vmov 0.0   ;;  %vm235_vm0 = vmmov 0   ;;  %v45_v1 = vld [vmem:[#allocation5 + $0x18] sm:$0xff]  ;;  %v44_v2 = vld [vmem:[#allocation5 + $0x10] sm:$0xff] }
  0x1c   :  { %146 = vmatprep.subr.mxu0 %v234_v0  ;;  %154 = vmatprep.mubr.msk.f32.mxu0 %vm235_vm0, %v234_v0  ;;  %v43_v3 = vld [vmem:[#allocation5 + $0x8] sm:$0xff]  ;;  %v42_v4 = vld [vmem:[#allocation5] sm:$0xff]  ;;  %v41_v5 = vld [vmem:[#allocation2] sm:$0x1]  ;;  %vm47_vm1 = vcmask 261120   ;;  %s236_s25 = smov [#allocation7]  }
  0x1d   :  { %147 = vmatpush3.msra.mxu0 %v45_v1  ;;  %v46_v6 = vld [vmem:[%s271_s2] sm:$0x1]  ;;  %s130_s26 = sshll.u32 %s236_s25, 4  ;;  %vm122_vm2 = vcmask 253952   ;;  %s131_s26 = int_to_ptr.vmem [resolvable:$true] %s130_s26 }
  0x1e   :  { %148 = vmatprep.subr.mxu0 %v234_v0  ;;  %s204_s27 = scalar_lea.vmem %s131_s26, 16  ;;  %s208_s28 = scalar_lea.vmem %s131_s26, 32 }
  0x1f   :  { %149 = vmatpush3.msra.mxu0 %v44_v2  ;;  %p205_p10 = scmp.ne.s32.totalorder %s131_s26, %s204_s27  ;;  %p209_p11 = scmp.lt.s32.totalorder %s131_s26, %s131_s26 }
  0x20   :  { %150 = vmatprep.subr.mxu0 %v234_v0  ;;  %p210_p12 = scmp.lt.s32.totalorder %s208_s28, %s204_s27 }
  0x21   :  { %151 = vmatpush3.msra.mxu0 %v43_v3 }
  0x22   :  { %152 = vmatprep.subr.mxu0 %v234_v0  ;;  %p211_p13 = por %p210_p12, %p209_p11 }
  0x23   :  { %153 = vmatpush3.msra.mxu0 %v42_v4 }
  0x24   :  { %155 = vmatmul.mubr.msk.f32.vlgmr.msra.gmra.mxu0 %vm47_vm1, %v41_v5  ;;  %p212_p0 = pnand %p211_p13, %p205_p10 }
  0xe4   :  { %v117_v7 = vpop.f32.mrf.mxu0 }
  0xe5   :  { %v118_v8 = vadd.f32 %v117_v7, %v46_v6 }
  0xe6   :  { %v156_v9 = vpop.f32.mrf.mxu0 }
  0xe7   :  { %v121_v10 = vmax.f32 %v118_v8, 0.0 }
  0xe9   :  { %123 = vst.msk [vmem:[#allocation7] sm:$0x1] %vm122_vm2, %v121_v10 }
  0xea   :  { %215 = shalt.err (!%p212_p0)
}
  0xeb   :  { %133 = dma.vmem_to_hbm [thread:$0]  %s131_s26, 16, %s272_s3, [#allocation4]  }
  0xec   :  { %228 = dma.done.wait [#allocation4], 16  }
  0xed   :  { %229 = vsyncadd [#allocation4], 4294967280 }
  0xee   :  { %137 = vsyncpa [#allocation3], 1 }
  0xef   :  { %138 = vsyncpa [#allocation6], 1 }
  0xf0   :  { %139 = vsyncpa [#allocation4], 1 }

</bundles_post_ra>
